<compile_context>
chip_gen: v7x
topology: tpu7x:2x2x1
jax: 0.10.0
libtpu: 0.0.40
codegen_flags: <defaults>
</compile_context>

<pallas_src>
import functools

import jax
import jax.numpy as jnp
from jax import lax
from jax.experimental import pallas as pl
from jax.experimental.pallas import tpu as pltpu


CONV_K = 12   # Conv1d kernel_size (stride 1, no padding)
POOL_K = 12   # MaxPool1d kernel_size
POOL_S = 5    # MaxPool1d stride


# -----------------------------------------------------------------------------
# Fused Pallas kernel: conv1d + maxpool + linear + relu + biLSTM(2 layers) + FC
# -----------------------------------------------------------------------------
def _cnn_lstm_kernel(patches_ref, wconv_ref, wpost_ref, bias_ref, out_ref,
                     *, B, H, O, Lpool, Lpad):
    """Single-invocation kernel (no grid); every operand lives fully in VMEM.

    patches_ref : (B*Lpad, K*Cin)  im2col patches (rows >= Lconv are zero pad)
    wconv_ref   : (K*Cin, H)       conv weight, (k,c)-major rows
    wpost_ref   : (Lpool*H + 6H, 6H) row-stacked [wlin | wl0 | wl1 | wlast]
                                   (wlin uses 2H lanes, wlast uses O lanes)
    bias_ref    : (1, 15H + O)     [bconv(H) | blin(2H) | bl0(6H) | bl1(6H) | blast(O)]
    out_ref     : (B, O)
    """
    H2, H4, H6 = 2 * H, 4 * H, 6 * H

    bconv = bias_ref[0:1, 0:H]
    blin = bias_ref[0:1, H:3 * H]
    bl0 = bias_ref[0:1, 3 * H:9 * H]
    bl1 = bias_ref[0:1, 9 * H:15 * H]
    blast = bias_ref[0:1, 15 * H:15 * H + O]

    # ---- Conv1d: one im2col matmul over the whole batch ---------------------
    conv = jnp.dot(patches_ref[...], wconv_ref[...],
                   preferred_element_type=jnp.float32) + bconv    # (B*Lpad, H)
    conv = conv.reshape(B, Lpad, H)                               # pad rows unused

    # ---- MaxPool1d + Linear + ReLU (fused, batched over B) ------------------
    lin = blin                                                    # (1, 2H)
    for p in range(Lpool):
        pooled = jnp.max(conv[:, p * POOL_S:p * POOL_S + POOL_K, :], axis=1)
        lin = lin + jnp.dot(pooled, wpost_ref[p * H:(p + 1) * H, 0:H2],
                            preferred_element_type=jnp.float32)   # (B, 2H)
    feat = jnp.maximum(lin, 0.0)                                  # ReLU
    # TODO(synk): dropout after ReLU / between LSTM layers skipped (eval mode).

    # ---- 2-layer bidirectional LSTM over the single time step ---------------
    # Gate columns packed (wrapper-side) as [i_f|i_b | o_f|o_b | g_f|g_b],
    # each block width H: one matmul + one sigmoid + one tanh covers both
    # directions, and h falls out in fwd|bwd lane order.  W_hh and the forget
    # gate contribute exactly nothing (seq_len=1, h0=c0=0) and are skipped.
    def bicell(g):                                   # g: (B, 6H)
        s = jax.nn.sigmoid(g[:, 0:H4])               # i (2H) | o (2H)
        gg = jnp.tanh(g[:, H4:H6])                   # g (2H)
        return s[:, H2:H4] * jnp.tanh(s[:, 0:H2] * gg)   # (B, 2H) fwd|bwd

    r = Lpool * H
    wl0 = wpost_ref[r:r + H2, :]                     # (2H, 6H)
    wl1 = wpost_ref[r + H2:r + 2 * H2, :]            # (2H, 6H)
    wlast = wpost_ref[r + 2 * H2:r + 3 * H2, 0:O]    # (2H, O)

    h0 = bicell(jnp.dot(feat, wl0, preferred_element_type=jnp.float32) + bl0)
    h1 = bicell(jnp.dot(h0, wl1, preferred_element_type=jnp.float32) + bl1)

    # ---- final Linear --------------------------------------------------------
    out = jnp.dot(h1, wlast, preferred_element_type=jnp.float32) + blast
    out_ref[...] = out.astype(out_ref.dtype)


# -----------------------------------------------------------------------------
# One-time weight layout prep (call once, cache the result)
# -----------------------------------------------------------------------------
def prepare_weights(params, *, sequence_length):
    """All layout plumbing (transposes, gate stacking, bias folding, packing).

    Returns (packed, meta): packed = dict of 3 device arrays to pass every
    call; meta = static Python ints describing the geometry.
    """
    w_conv, b_conv = params["conv1"]          # (H, Cin, K), (H,)
    w_lin, b_lin = params["linear"]           # (2H, H*Lpool), (2H,)
    w_last, b_last = params["last_linear"]    # (O, 2H), (O,)

    H, Cin, K = w_conv.shape
    Lconv = sequence_length - K + 1
    Lpool = (Lconv - POOL_K) // POOL_S + 1
    O = w_last.shape[0]
    assert Lconv >= POOL_K, "sequence too short for conv+maxpool"
    # Guarded invariants for the skipped-W_hh / skipped-forget-gate optimization
    # and the hard-coded 2-layer bidirectional structure.
    for layer in range(2):
        for d in range(2):
            assert f"lstm_l{layer}_d{d}" in params

    # Conv weight, (k, c)-major rows to match im2col patch layout.
    wconv_2d = jnp.transpose(w_conv, (2, 1, 0)).reshape(K * Cin, H)

    # PyTorch flattens (B, H, Lpool) as c*Lpool + p; permute the Linear weight
    # so the kernel consumes pooled features in (p, c)-major row order.
    wlin_flat = jnp.transpose(w_lin.reshape(2 * H, H, Lpool),
                              (2, 1, 0)).reshape(Lpool * H, 2 * H)

    def pack_lstm(layer):
        w_ihf, _, b_ihf, b_hhf = params[f"lstm_l{layer}_d0"]
        w_ihb, _, b_ihb, b_hhb = params[f"lstm_l{layer}_d1"]
        Wf, Wb = w_ihf.T, w_ihb.T                   # (in, 4H), gate cols i,f,g,o
        bf, bb = b_ihf + b_hhf, b_ihb + b_hhb       # W_hh unused: seq=1, h0=c0=0
        sl_i, sl_g, sl_o = slice(0, H), slice(2 * H, 3 * H), slice(3 * H, 4 * H)
        W = jnp.concatenate([Wf[:, sl_i], Wb[:, sl_i],
                             Wf[:, sl_o], Wb[:, sl_o],
                             Wf[:, sl_g], Wb[:, sl_g]], axis=1)   # (in, 6H)
        b = jnp.concatenate([bf[sl_i], bb[sl_i], bf[sl_o], bb[sl_o],
                             bf[sl_g], bb[sl_g]])                 # (6H,)
        return W, b

    wl0, bl0 = pack_lstm(0)
    wl1, bl1 = pack_lstm(1)
    wlast_t = w_last.T                                             # (2H, O)

    LW = 6 * H
    def padlane(w):
        return jnp.pad(w, ((0, 0), (0, LW - w.shape[1])))

    wpost = jnp.concatenate(
        [padlane(wlin_flat), wl0, wl1, padlane(wlast_t)], axis=0
    ).astype(jnp.float32)                                          # (Lpool*H+6H, 6H)

    biases = jnp.concatenate(
        [b_conv, b_lin, bl0, bl1, b_last]).reshape(1, -1).astype(jnp.float32)

    packed = dict(wconv=wconv_2d.astype(jnp.float32), wpost=wpost, biases=biases)
    meta = dict(H=int(H), Cin=int(Cin), K=int(K), Lconv=int(Lconv),
                Lpool=int(Lpool), O=int(O))
    return packed, meta


# -----------------------------------------------------------------------------
# Per-call wrapper: im2col of x + single pallas_call (jit this)
# -----------------------------------------------------------------------------
def cnn_lstm_forward(x, packed, *, meta):
    """Fused CNN_LSTM forward (eval mode). x: (B, seq_len, input_size)."""
    B, L, Cin = x.shape
    H, K, Lconv, Lpool, O = (meta["H"], meta["K"], meta["Lconv"],
                             meta["Lpool"], meta["O"])
    assert Lconv == L - K + 1 and Cin == meta["Cin"]
    Lpad = ((Lconv + 7) // 8) * 8

    # im2col (input-dependent layout plumbing, outside the kernel).
    t_idx = jnp.arange(Lconv)[:, None] + jnp.arange(K)[None, :]    # (Lconv, K)
    patches = x[:, t_idx, :].reshape(B, Lconv, K * Cin)
    patches = jnp.pad(patches, ((0, 0), (0, Lpad - Lconv), (0, 0)))
    patches = patches.reshape(B * Lpad, K * Cin).astype(jnp.float32)

    kernel = functools.partial(_cnn_lstm_kernel, B=B, H=H, O=O,
                               Lpool=Lpool, Lpad=Lpad)
    vmem = pl.BlockSpec(memory_space=pltpu.MemorySpace.VMEM)
    return pl.pallas_call(
        kernel,
        out_shape=jax.ShapeDtypeStruct((B, O), jnp.float32),
        in_specs=[vmem, vmem, vmem, vmem],
        out_specs=vmem,
    )(patches, packed["wconv"], packed["wpost"], packed["biases"])


# -----------------------------------------------------------------------------
# Pure-JAX reference (full PyTorch semantics, incl. W_hh and forget gate)
# -----------------------------------------------------------------------------
def _ref_lstm(x_btd, params, *, num_layers, hidden, bidirectional):
    B, _, _ = x_btd.shape
    H = hidden
    num_dir = 2 if bidirectional else 1
    layer_in = x_btd
    for layer in range(num_layers):
        outs = []
        for d in range(num_dir):
            w_ih, w_hh, b_ih, b_hh = params[f"lstm_l{layer}_d{d}"]
            xin = layer_in if d == 0 else layer_in[:, ::-1, :]

            def step(carry, x_t, w_ih=w_ih, w_hh=w_hh, b_ih=b_ih, b_hh=b_hh):
                h, c = carry
                g = x_t @ w_ih.T + b_ih + h @ w_hh.T + b_hh
                i = jax.nn.sigmoid(g[:, :H])
                f = jax.nn.sigmoid(g[:, H:2 * H])
                gg = jnp.tanh(g[:, 2 * H:3 * H])
                o = jax.nn.sigmoid(g[:, 3 * H:])
                c = f * c + i * gg
                h = o * jnp.tanh(c)
                return (h, c), h

            init = (jnp.zeros((B, H), jnp.float32), jnp.zeros((B, H), jnp.float32))
            _, hs = lax.scan(step, init, jnp.transpose(xin, (1, 0, 2)))
            y = jnp.transpose(hs, (1, 0, 2))
            if d == 1:
                y = y[:, ::-1, :]
            outs.append(y)
        layer_in = jnp.concatenate(outs, axis=-1) if num_dir == 2 else outs[0]
    return layer_in


def _ref_forward(x, params, *, hidden_size, num_layers, bidirectional):
    w_conv, b_conv = params["conv1"]
    w_lin, b_lin = params["linear"]
    w_last, b_last = params["last_linear"]
    B = x.shape[0]
    Cout, Cin, K = w_conv.shape

    xp = jnp.transpose(x, (0, 2, 1))                               # (B, Cin, L)
    L = xp.shape[2]
    Lconv = L - K + 1
    patches = jnp.stack(
        [xp[:, :, t:t + K].reshape(B, Cin * K) for t in range(Lconv)], axis=1)
    conv = patches @ w_conv.reshape(Cout, Cin * K).T + b_conv      # (B, Lconv, Cout)
    conv = jnp.transpose(conv, (0, 2, 1))                          # (B, Cout, Lconv)

    Lpool = (Lconv - POOL_K) // POOL_S + 1
    pooled = jnp.stack(
        [jnp.max(conv[:, :, p * POOL_S:p * POOL_S + POOL_K], axis=-1)
         for p in range(Lpool)], axis=-1)                          # (B, Cout, Lpool)

    flat = pooled.reshape(B, -1)                                   # torch.flatten(x, 1)
    lin = jnp.maximum(flat @ w_lin.T + b_lin, 0.0)                 # Linear + ReLU
    lstm_in = lin.reshape(B, 1, -1)                                # (B, 1, 2H)
    lstm_out = _ref_lstm(lstm_in, params, num_layers=num_layers,
                         hidden=hidden_size, bidirectional=bidirectional)
    out_flat = lstm_out.reshape(B, -1)                             # (B, 2H)
    return out_flat @ w_last.T + b_last


# -----------------------------------------------------------------------------
# Main
# -----------------------------------------------------------------------------
if __name__ == "__main__":
    # Module hyperparameters (matching the PyTorch __init__ signature).
    input_size = 16
    hidden_size = 32
    is_bidirectional = True
    num_layers = 2
    output_size = 5
    sequence_length = 30          # must be >= 23 for conv(k=12) + maxpool(k=12)
    batch = 2
    num_dir = 2 if is_bidirectional else 1

    H = hidden_size
    conv_len = sequence_length - CONV_K + 1            # 19
    pool_len = (conv_len - POOL_K) // POOL_S + 1       # 2
    max_pool_output = H * pool_len                     # calc_maxpool_output -> 64

    key = jax.random.PRNGKey(0)

    def unif(k, shape, fan_in):
        s = float(fan_in) ** -0.5
        return jax.random.uniform(k, shape, jnp.float32, -s, s)

    params = {}
    key, k1, k2 = jax.random.split(key, 3)
    params["conv1"] = (unif(k1, (H, input_size, CONV_K), input_size * CONV_K),
                       unif(k2, (H,), input_size * CONV_K))
    key, k1, k2 = jax.random.split(key, 3)
    params["linear"] = (unif(k1, (2 * H, max_pool_output), max_pool_output),
                        unif(k2, (2 * H,), max_pool_output))
    for layer in range(num_layers):
        in_sz = 2 * H if layer == 0 else H * num_dir
        for d in range(num_dir):
            key, k1, k2, k3, k4 = jax.random.split(key, 5)
            params[f"lstm_l{layer}_d{d}"] = (
                unif(k1, (4 * H, in_sz), H),
                unif(k2, (4 * H, H), H),
                unif(k3, (4 * H,), H),
                unif(k4, (4 * H,), H),
            )
    key, k1, k2 = jax.random.split(key, 3)
    params["last_linear"] = (unif(k1, (output_size, H * num_dir), H * num_dir),
                             unif(k2, (output_size,), H * num_dir))

    key, kx = jax.random.split(key)
    x = jax.random.normal(kx, (batch, sequence_length, input_size), jnp.float32)

    # One-time (cached) weight layout prep, then the jitted per-call path.
    packed, meta = prepare_weights(params, sequence_length=sequence_length)
    packed = jax.tree_util.tree_map(jax.block_until_ready, packed)

    fwd = jax.jit(functools.partial(cnn_lstm_forward, meta=meta))
    out = jax.block_until_ready(fwd(x, packed))

    ref = _ref_forward(x, params, hidden_size=H, num_layers=num_layers,
                       bidirectional=is_bidirectional)
    assert out.shape == (batch, output_size), out.shape
    assert jnp.allclose(out, ref, atol=1e-4, rtol=1e-4), (out, ref)

    print("KERNEL_OK")
</pallas_src>

<mosaic_0001>
module attributes {stable_mosaic.version = 11 : i64} {
  func.func @_cnn_lstm_kernel(%arg0: memref<48x192xf32, #tpu.memory_space<vmem>>, %arg1: memref<192x32xf32, #tpu.memory_space<vmem>>, %arg2: memref<256x192xf32, #tpu.memory_space<vmem>>, %arg3: memref<1x485xf32, #tpu.memory_space<vmem>>, %arg4: memref<2x5xf32, #tpu.memory_space<vmem>>) attributes {dimension_semantics = [], scalar_prefetch = 0 : i64, scratch_operands = 0 : i64, tpu.core_type = #tpu.core_type<tc>} {
    %c0 = arith.constant 0 : index
    %c0_0 = arith.constant 0 : index
    %0 = vector.load %arg3[%c0, %c0_0] : memref<1x485xf32, #tpu.memory_space<vmem>>, vector<1x32xf32>
    %c0_1 = arith.constant 0 : index
    %c32 = arith.constant 32 : index
    %1 = vector.load %arg3[%c0_1, %c32] : memref<1x485xf32, #tpu.memory_space<vmem>>, vector<1x64xf32>
    %c0_2 = arith.constant 0 : index
    %c96 = arith.constant 96 : index
    %2 = vector.load %arg3[%c0_2, %c96] : memref<1x485xf32, #tpu.memory_space<vmem>>, vector<1x192xf32>
    %c0_3 = arith.constant 0 : index
    %c288 = arith.constant 288 : index
    %3 = vector.load %arg3[%c0_3, %c288] : memref<1x485xf32, #tpu.memory_space<vmem>>, vector<1x192xf32>
    %c0_4 = arith.constant 0 : index
    %c480 = arith.constant 480 : index
    %4 = vector.load %arg3[%c0_4, %c480] : memref<1x485xf32, #tpu.memory_space<vmem>>, vector<1x5xf32>
    %c0_5 = arith.constant 0 : index
    %c0_6 = arith.constant 0 : index
    %5 = vector.load %arg0[%c0_5, %c0_6] : memref<48x192xf32, #tpu.memory_space<vmem>>, vector<48x192xf32>
    %c0_7 = arith.constant 0 : index
    %c0_8 = arith.constant 0 : index
    %6 = vector.load %arg1[%c0_7, %c0_8] : memref<192x32xf32, #tpu.memory_space<vmem>>, vector<192x32xf32>
    %cst = arith.constant dense<0.000000e+00> : vector<48x32xf32>
    %7 = tpu.matmul %5, %6, %cst {dimension_numbers = #tpu.dot_dimension_numbers<[1], [0], [0], [1], [0, 0, 1, 1], [], []>} : vector<48x192xf32>, vector<192x32xf32>, vector<48x32xf32> -> vector<48x32xf32>
    %8 = vector.broadcast %0 : vector<1x32xf32> to vector<48x32xf32>
    %9 = arith.addf %7, %8 : vector<48x32xf32>
    %10 = vector.shape_cast %9 : vector<48x32xf32> to vector<2x24x32xf32>
    %11 = vector.extract_strided_slice %10 {offsets = [0, 0, 0], sizes = [2, 12, 32], strides = [1, 1, 1]} : vector<2x24x32xf32> to vector<2x12x32xf32>
    %cst_9 = arith.constant dense<0xFF800000> : vector<2x32xf32>
    %12 = vector.multi_reduction <maximumf>, %11, %cst_9 [1] : vector<2x12x32xf32> to vector<2x32xf32>
    %c0_10 = arith.constant 0 : index
    %c0_11 = arith.constant 0 : index
    %13 = vector.load %arg2[%c0_10, %c0_11] : memref<256x192xf32, #tpu.memory_space<vmem>>, vector<32x64xf32>
    %cst_12 = arith.constant dense<0.000000e+00> : vector<2x64xf32>
    %14 = tpu.matmul %12, %13, %cst_12 {dimension_numbers = #tpu.dot_dimension_numbers<[1], [0], [0], [1], [0, 0, 1, 1], [], []>} : vector<2x32xf32>, vector<32x64xf32>, vector<2x64xf32> -> vector<2x64xf32>
    %15 = vector.broadcast %1 : vector<1x64xf32> to vector<2x64xf32>
    %16 = arith.addf %15, %14 : vector<2x64xf32>
    %17 = vector.extract_strided_slice %10 {offsets = [0, 5, 0], sizes = [2, 12, 32], strides = [1, 1, 1]} : vector<2x24x32xf32> to vector<2x12x32xf32>
    %cst_13 = arith.constant dense<0xFF800000> : vector<2x32xf32>
    %18 = vector.multi_reduction <maximumf>, %17, %cst_13 [1] : vector<2x12x32xf32> to vector<2x32xf32>
    %c32_14 = arith.constant 32 : index
    %c0_15 = arith.constant 0 : index
    %19 = vector.load %arg2[%c32_14, %c0_15] : memref<256x192xf32, #tpu.memory_space<vmem>>, vector<32x64xf32>
    %cst_16 = arith.constant dense<0.000000e+00> : vector<2x64xf32>
    %20 = tpu.matmul %18, %19, %cst_16 {dimension_numbers = #tpu.dot_dimension_numbers<[1], [0], [0], [1], [0, 0, 1, 1], [], []>} : vector<2x32xf32>, vector<32x64xf32>, vector<2x64xf32> -> vector<2x64xf32>
    %21 = arith.addf %16, %20 : vector<2x64xf32>
    %cst_17 = arith.constant 0.000000e+00 : f32
    %22 = vector.broadcast %cst_17 : f32 to vector<2x64xf32>
    %23 = arith.maximumf %21, %22 : vector<2x64xf32>
    %c64 = arith.constant 64 : index
    %c0_18 = arith.constant 0 : index
    %24 = vector.load %arg2[%c64, %c0_18] : memref<256x192xf32, #tpu.memory_space<vmem>>, vector<64x192xf32>
    %c128 = arith.constant 128 : index
    %c0_19 = arith.constant 0 : index
    %25 = vector.load %arg2[%c128, %c0_19] : memref<256x192xf32, #tpu.memory_space<vmem>>, vector<64x192xf32>
    %c192 = arith.constant 192 : index
    %c0_20 = arith.constant 0 : index
    %26 = vector.load %arg2[%c192, %c0_20] : memref<256x192xf32, #tpu.memory_space<vmem>>, vector<64x5xf32>
    %cst_21 = arith.constant dense<0.000000e+00> : vector<2x192xf32>
    %27 = tpu.matmul %23, %24, %cst_21 {dimension_numbers = #tpu.dot_dimension_numbers<[1], [0], [0], [1], [0, 0, 1, 1], [], []>} : vector<2x64xf32>, vector<64x192xf32>, vector<2x192xf32> -> vector<2x192xf32>
    %28 = vector.broadcast %2 : vector<1x192xf32> to vector<2x192xf32>
    %29 = arith.addf %27, %28 : vector<2x192xf32>
    %30 = vector.extract_strided_slice %29 {offsets = [0, 0], sizes = [2, 128], strides = [1, 1]} : vector<2x192xf32> to vector<2x128xf32>
    %31 = arith.negf %30 : vector<2x128xf32>
    %32 = math.exp %31 : vector<2x128xf32>
    %cst_22 = arith.constant 1.000000e+00 : f32
    %33 = vector.broadcast %cst_22 : f32 to vector<2x128xf32>
    %34 = arith.addf %33, %32 : vector<2x128xf32>
    %35 = arith.divf %33, %34 : vector<2x128xf32>
    %36 = vector.extract_strided_slice %29 {offsets = [0, 128], sizes = [2, 64], strides = [1, 1]} : vector<2x192xf32> to vector<2x64xf32>
    %37 = math.tanh %36 : vector<2x64xf32>
    %38 = vector.extract_strided_slice %35 {offsets = [0, 64], sizes = [2, 64], strides = [1, 1]} : vector<2x128xf32> to vector<2x64xf32>
    %39 = vector.extract_strided_slice %35 {offsets = [0, 0], sizes = [2, 64], strides = [1, 1]} : vector<2x128xf32> to vector<2x64xf32>
    %40 = arith.mulf %39, %37 : vector<2x64xf32>
    %41 = math.tanh %40 : vector<2x64xf32>
    %42 = arith.mulf %38, %41 : vector<2x64xf32>
    %cst_23 = arith.constant dense<0.000000e+00> : vector<2x192xf32>
    %43 = tpu.matmul %42, %25, %cst_23 {dimension_numbers = #tpu.dot_dimension_numbers<[1], [0], [0], [1], [0, 0, 1, 1], [], []>} : vector<2x64xf32>, vector<64x192xf32>, vector<2x192xf32> -> vector<2x192xf32>
    %44 = vector.broadcast %3 : vector<1x192xf32> to vector<2x192xf32>
    %45 = arith.addf %43, %44 : vector<2x192xf32>
    %46 = vector.extract_strided_slice %45 {offsets = [0, 0], sizes = [2, 128], strides = [1, 1]} : vector<2x192xf32> to vector<2x128xf32>
    %47 = arith.negf %46 : vector<2x128xf32>
    %48 = math.exp %47 : vector<2x128xf32>
    %cst_24 = arith.constant 1.000000e+00 : f32
    %49 = vector.broadcast %cst_24 : f32 to vector<2x128xf32>
    %50 = arith.addf %49, %48 : vector<2x128xf32>
    %51 = arith.divf %49, %50 : vector<2x128xf32>
    %52 = vector.extract_strided_slice %45 {offsets = [0, 128], sizes = [2, 64], strides = [1, 1]} : vector<2x192xf32> to vector<2x64xf32>
    %53 = math.tanh %52 : vector<2x64xf32>
    %54 = vector.extract_strided_slice %51 {offsets = [0, 64], sizes = [2, 64], strides = [1, 1]} : vector<2x128xf32> to vector<2x64xf32>
    %55 = vector.extract_strided_slice %51 {offsets = [0, 0], sizes = [2, 64], strides = [1, 1]} : vector<2x128xf32> to vector<2x64xf32>
    %56 = arith.mulf %55, %53 : vector<2x64xf32>
    %57 = math.tanh %56 : vector<2x64xf32>
    %58 = arith.mulf %54, %57 : vector<2x64xf32>
    %cst_25 = arith.constant dense<0.000000e+00> : vector<2x5xf32>
    %59 = tpu.matmul %58, %26, %cst_25 {dimension_numbers = #tpu.dot_dimension_numbers<[1], [0], [0], [1], [0, 0, 1, 1], [], []>} : vector<2x64xf32>, vector<64x5xf32>, vector<2x5xf32> -> vector<2x5xf32>
    %60 = vector.broadcast %4 : vector<1x5xf32> to vector<2x5xf32>
    %61 = arith.addf %59, %60 : vector<2x5xf32>
    %c0_26 = arith.constant 0 : index
    %c0_27 = arith.constant 0 : index
    %62 = vector.load %arg4[%c0_26, %c0_27] : memref<2x5xf32, #tpu.memory_space<vmem>>, vector<2x5xf32>
    tpu.vector_store %arg4[%c0_26, %c0_27], %61 {strides = array<i32>} : memref<2x5xf32, #tpu.memory_space<vmem>>, vector<2x5xf32>,
    return
  }
}

</mosaic_0001>

<bundles_post_ra>
// kernel: cnn_lstm_forward.1
= control target key start
LH: loop header
LB: loop body
LE: loop exit
PB: predicated region body
PF: predicated region fallthrough
CT: control target
= control target key end

     0   :  { %v965_v3 = vmov 0.0|0.0   ;;  %vm64_vm0 = vcmask 523264   ;;  %s1361_s0 = inlined_call_operand.vmem [shape: f32[48,192], index: 0, kind: input, shape index: {}]   ;;  %s1362_s1 = inlined_call_operand.vmem [shape: f32[192,32], index: 1, kind: input, shape index: {}]   ;;  %s1363_s2 = inlined_call_operand.vmem [shape: f32[256,192], index: 2, kind: input, shape index: {}]   ;;  %s1364_s3 = inlined_call_operand.vmem [shape: f32[1,485], index: 3, kind: input, shape index: {}]   ;;  %s1365_s4 = inlined_call_operand.hbm [shape: f32[2,5], index: 4, kind: output, shape index: {}]  }
   0x1   :  { %v34_v0 = vld [vmem:[%s1362_s1] sm:$0xff]  ;;  %v35_v1 = vld [vmem:[%s1362_s1 + $0x8] sm:$0xff]  ;;  %v36_v2 = vld [vmem:[%s1362_s1 + $0x10] sm:$0xff]  ;;  %826 = vmatprep.subr.bf16.mxu0 %v965_v3  ;;  %862 = vmatprep.subr.bf16.mxu1 %v965_v3 }
   0x2   :  { %v827_v4 = vpack.c.bf16 %v35_v1, %v34_v0  ;;  %v37_v5 = vld [vmem:[%s1362_s1 + $0x18] sm:$0xff]  ;;  %v38_v7 = vld [vmem:[%s1362_s1 + $0x20] sm:$0xff]  ;;  %v39_v8 = vld [vmem:[%s1362_s1 + $0x28] sm:$0xff] }
   0x3   :  { %v830_v6 = vpack.c.bf16 %v37_v5, %v36_v2  ;;  %v833_v9 = vpack.c.bf16 %v39_v8, %v38_v7  ;;  %v40_v10 = vld [vmem:[%s1362_s1 + $0x30] sm:$0xff]  ;;  %v41_v11 = vld [vmem:[%s1362_s1 + $0x38] sm:$0xff]  ;;  %v23_v12 = vld [vmem:[%s1361_s0 + $0x8] sm:$0xff] }
   0x4   :  { %828 = vmatpush1.bf16.msra.mxu0 %v827_v4  ;;  %752 = vmatprep.mubr.msk.f32.mxu0 %vm64_vm0, %v23_v12  ;;  %v836_v13 = vpack.c.bf16 %v41_v11, %v40_v10  ;;  %v42_v14 = vld [vmem:[%s1362_s1 + $0x40] sm:$0xff]  ;;  %v43_v15 = vld [vmem:[%s1362_s1 + $0x48] sm:$0xff] }
   0x5   :  { %829 = vmatprep.subr.bf16.mxu0 %v965_v3 }
   0x8   :  { %831 = vmatpush1.bf16.msra.mxu0 %v830_v6 }
   0x9   :  { %832 = vmatprep.subr.bf16.mxu0 %v965_v3 }
   0xc   :  { %834 = vmatpush1.bf16.msra.mxu0 %v833_v9 }
   0xd   :  { %835 = vmatprep.subr.bf16.mxu0 %v965_v3 }
   0xe   :  { %9 = vsyncpa [#allocation3], 0  ;;  %v839_v16 = vpack.c.bf16 %v43_v15, %v42_v14  ;;  %v44_v17 = vld [vmem:[%s1362_s1 + $0x50] sm:$0xff]  ;;  %v45_v18 = vld [vmem:[%s1362_s1 + $0x58] sm:$0xff]  ;;  %vm966_vm1 = vmmov 0   ;;  %v967_v55 = vmov 0.0  }
   0xf   :  { %v842_v19 = vpack.c.bf16 %v45_v18, %v44_v17  ;;  %v46_v20 = vld [vmem:[%s1362_s1 + $0x60] sm:$0xff]  ;;  %v47_v21 = vld [vmem:[%s1362_s1 + $0x68] sm:$0xff]  ;;  %v48_v23 = vld [vmem:[%s1362_s1 + $0x70] sm:$0xff]  ;;  %793 = vmatprep.mubr.msk.f32.mxu1 %vm966_vm1, %v967_v55  ;;  %vm178_vm2 = vcmask 261120   ;;  %vm180_vm3 = vcmask 257024   ;;  %vm283_vm4 = vcmask 261125  }
  0x10   :  { %837 = vmatpush1.bf16.msra.mxu0 %v836_v13  ;;  %v845_v22 = vpack.c.bf16 %v47_v21, %v46_v20  ;;  %v49_v24 = vld [vmem:[%s1362_s1 + $0x78] sm:$0xff]  ;;  %v50_v26 = vld [vmem:[%s1362_s1 + $0x80] sm:$0xff]  ;;  %v51_v27 = vld [vmem:[%s1362_s1 + $0x88] sm:$0xff]  ;;  %vm286_vm5 = vcmask 253952   ;;  %vm204_vm6 = vcmask 1041409   ;;  %s968_s30 = smov 32  }
  0x11   :  { %838 = vmatprep.subr.bf16.mxu0 %v965_v3  ;;  %v848_v25 = vpack.c.bf16 %v49_v24, %v48_v23  ;;  %v851_v28 = vpack.c.bf16 %v51_v27, %v50_v26  ;;  %v52_v29 = vld [vmem:[%s1362_s1 + $0x90] sm:$0xff]  ;;  %v53_v30 = vld [vmem:[%s1362_s1 + $0x98] sm:$0xff]  ;;  %v54_v32 = vld [vmem:[%s1362_s1 + $0xa0] sm:$0xff]  ;;  %s969_s6 = smov 96   ;;  %s970_s13 = smov 64   ;;  %vm561_vm7 = vcmask 785408  }
  0x12   :  { %v854_v31 = vpack.c.bf16 %v53_v30, %v52_v29  ;;  %v55_v33 = vld [vmem:[%s1362_s1 + $0xa8] sm:$0xff]  ;;  %v56_v35 = vld [vmem:[%s1362_s1 + $0xb0] sm:$0xff]  ;;  %v57_v36 = vld [vmem:[%s1362_s1 + $0xb8] sm:$0xff]  ;;  %vm735_vm8 = vcmask 33792  }
  0x13   :  { %v857_v34 = vpack.c.bf16 %v55_v33, %v54_v32  ;;  %v860_v37 = vpack.c.bf16 %v57_v36, %v56_v35  ;;  %v22_v38 = vld [vmem:[%s1361_s0] sm:$0xff]  ;;  %v25_v39 = vld [vmem:[%s1361_s0 + $0x18] sm:$0xff]  ;;  %v24_v40 = vld [vmem:[%s1361_s0 + $0x10] sm:$0xff] }
  0x14   :  { %840 = vmatpush1.bf16.msra.mxu0 %v839_v16  ;;  %v27_v41 = vld [vmem:[%s1361_s0 + $0x28] sm:$0xff]  ;;  %v26_v42 = vld [vmem:[%s1361_s0 + $0x20] sm:$0xff]  ;;  %v29_v43 = vld [vmem:[%s1361_s0 + $0x38] sm:$0xff] }
  0x15   :  { %841 = vmatprep.subr.bf16.mxu0 %v965_v3  ;;  %v28_v44 = vld [vmem:[%s1361_s0 + $0x30] sm:$0xff]  ;;  %v31_v45 = vld [vmem:[%s1361_s0 + $0x48] sm:$0xff]  ;;  %v30_v46 = vld [vmem:[%s1361_s0 + $0x40] sm:$0xff] }
  0x16   :  { %v33_v47 = vld [vmem:[%s1361_s0 + $0x58] sm:$0xff]  ;;  %v32_v48 = vld [vmem:[%s1361_s0 + $0x50] sm:$0xff]  ;;  %v198_v49 = vld [vmem:[%s1363_s2] sm:$0xff] }
  0x17   :  { %v199_v50 = vld [vmem:[%s1363_s2 + $0x10] sm:$0xff]  ;;  %v200_v52 = vld [vmem:[%s1363_s2 + $0x20] sm:$0xff] }
  0x18   :  { %843 = vmatpush1.bf16.msra.mxu0 %v842_v19  ;;  %v863_v51 = vpack.c.bf16 %v199_v50, %v198_v49  ;;  %v201_v53 = vld [vmem:[%s1363_s2 + $0x30] sm:$0xff]  ;;  %v1143_v56 = vld [vmem:[%s1364_s3] ss:$0 sm:$0xff] }
  0x19   :  { %844 = vmatprep.subr.bf16.mxu0 %v965_v3  ;;  %v866_v54 = vpack.c.bf16 %v201_v53, %v200_v52  ;;  %v309_v50 = vld [vmem:[%s1363_s2 + $0x60] sm:$0xff] }
  0x1a   :  { %864 = vmatpush3.bf16.msra.mxu1 %v863_v51  ;;  %v310_v51 = vld [vmem:[%s1363_s2 + $0x70] sm:$0xff] }
  0x1b   :  { %865 = vmatprep.subr.bf16.mxu1 %v965_v3 }
  0x1c   :  { %846 = vmatpush1.bf16.msra.mxu0 %v845_v22 }
  0x1d   :  { %847 = vmatprep.subr.bf16.mxu0 %v965_v3 }
  0x1e   :  { %867 = vmatpush3.bf16.msra.mxu1 %v866_v54 }
  0x1f   :  { %868 = vmatprep.subr.bf16.mxu1 %v965_v3 }
  0x20   :  { %849 = vmatpush1.bf16.msra.mxu0 %v848_v25 }
  0x21   :  { %850 = vmatprep.subr.bf16.mxu0 %v965_v3 }
  0x24   :  { %852 = vmatpush1.bf16.msra.mxu0 %v851_v28 }
  0x25   :  { %853 = vmatprep.subr.bf16.mxu0 %v965_v3 }
  0x28   :  { %855 = vmatpush1.bf16.msra.mxu0 %v854_v31 }
  0x29   :  { %856 = vmatprep.subr.bf16.mxu0 %v965_v3 }
  0x2c   :  { %858 = vmatpush1.bf16.msra.mxu0 %v857_v34 }
  0x2d   :  { %859 = vmatprep.subr.bf16.mxu0 %v965_v3 }
  0x30   :  { %861 = vmatpush1.bf16.msra.mxu0 %v860_v37 }
  0x33   :  { %148 = vmatmul.mubr.f32.vlgmr.msra.gmra.mrb[0].mxu0 %v22_v38 }
  0x34   :  { %753 = vmatprep.mubr.msk.f32.mxu0 %vm64_vm0, %v25_v39 }
  0x37   :  { %153 = vmatmul.mubr.f32.gmra.mrb[2].mxu0 %v24_v40 }
  0x38   :  { %754 = vmatprep.mubr.msk.f32.mxu0 %vm64_vm0, %v27_v41  ;;  %v307_v41 = vld [vmem:[%s1363_s2 + $0x40] sm:$0xff] }
  0x3b   :  { %158 = vmatmul.mubr.f32.gmra.mrb[4].mxu0 %v26_v42  ;;  %v308_v42 = vld [vmem:[%s1363_s2 + $0x50] sm:$0xff] }
  0x3c   :  { %755 = vmatprep.mubr.msk.f32.mxu0 %vm64_vm0, %v29_v43  ;;  %v869_v49 = vpack.c.bf16 %v308_v42, %v307_v41 }
  0x3f   :  { %163 = vmatmul.mubr.f32.gmra.mrb[6].mxu0 %v28_v44 }
  0x40   :  { %756 = vmatprep.mubr.msk.f32.mxu0 %vm64_vm0, %v31_v45 }
  0x43   :  { %168 = vmatmul.mubr.f32.gmra.mrb[8].mxu0 %v30_v46 }
  0x44   :  { %757 = vmatprep.mubr.msk.f32.mxu0 %vm64_vm0, %v33_v47 }
  0x47   :  { %173 = vmatmul.mubr.f32.gmra.mrb[10].mxu0 %v32_v48 }
 0x106   :  { %v149_v57 = vpop.f32.mrb[0].mxu0 }
 0x107   :  { %v151_v58 = vpop.f32.mrb[1].mxu0  ;;  %v150_v59 = vadd.f32 %v1143_v56, %v149_v57 }
 0x108   :  { %v872_v58 = vpack.c.bf16 %v310_v51, %v309_v50 }
 0x109   :  { %v179_v63 = vsel %vm178_vm2, %v150_v59, -inf  ;;  %v284_v6 = vsel %vm283_vm4, %v150_v59, -inf }
 0x10a   :  { %v154_v60 = vpop.f32.mrb[2].mxu0 }
 0x10b   :  { %v155_v61 = vadd.f32 %v1143_v56, %v154_v60  ;;  %v156_v62 = vpop.f32.mrb[3].mxu0 }
 0x10d   :  { %v181_v0 = vsel %vm180_vm3, %v155_v61, -inf  ;;  %v285_v11 = vsel %vm178_vm2, %v155_v61, -inf }
 0x10e   :  { %v182_v1 = vmax.f32 %v179_v63, %v181_v0  ;;  %v159_v2 = vpop.f32.mrb[4].mxu0  ;;  %v393_v63 = vld [vmem:[%s1363_s2 + $0x88] sm:$0xff]  ;;  %v395_v0 = vld [vmem:[%s1363_s2 + $0x98] sm:$0xff] }
 0x10f   :  { %v160_v4 = vadd.f32 %v1143_v56, %v159_v2  ;;  %v161_v5 = vpop.f32.mrb[5].mxu0 }
 0x110   :  { %v183_v8 = vrot.slane %v182_v1, 4  ;;  %v394_v5 = vld [vmem:[%s1363_s2 + $0x90] sm:$0xff] }
 0x111   :  { %v287_v7 = vsel %vm286_vm5, %v160_v4, -inf  ;;  %v874_v4 = vpack.c.bf16 %v395_v0, %v393_v63  ;;  %v413_v63 = vld [vmem:[%s1363_s2 + $0x128] sm:$0xff]  ;;  %v415_v0 = vld [vmem:[%s1363_s2 + $0x138] sm:$0xff] }
 0x112   :  { %v288_v9 = vmax.f32 %v284_v6, %v287_v7  ;;  %v164_v10 = vpop.f32.mrb[6].mxu0  ;;  %v184_v15 = vmax.f32 %v182_v1, %v183_v8  ;;  %v392_v1 = vld [vmem:[%s1363_s2 + $0x80] sm:$0xff]  ;;  %v397_v6 = vld [vmem:[%s1363_s2 + $0xa8] sm:$0xff]  ;;  %v399_v7 = vld [vmem:[%s1363_s2 + $0xb8] sm:$0xff] }
 0x113   :  { %v166_v12 = vpop.f32.mrb[7].mxu0  ;;  %v165_v14 = vadd.f32 %v1143_v56, %v164_v10  ;;  %v876_v8 = vpack.c.bf16 %v394_v5, %v392_v1  ;;  %v396_v10 = vld [vmem:[%s1363_s2 + $0xa0] sm:$0xff]  ;;  %v414_v5 = vld [vmem:[%s1363_s2 + $0x130] sm:$0xff] }
 0x114   :  { %v289_v13 = vmax.f32 %v288_v9, %v285_v11  ;;  %v185_v22 = vrot.slane %v184_v15, 2  ;;  %v878_v9 = vpack.c.bf16 %v399_v7, %v397_v6  ;;  %v398_v11 = vld [vmem:[%s1363_s2 + $0xb0] sm:$0xff]  ;;  %v401_v12 = vld [vmem:[%s1363_s2 + $0xc8] sm:$0xff]  ;;  %v419_v7 = vld [vmem:[%s1363_s2 + $0x158] sm:$0xff] }
 0x115   :  { %v189_v20 = vsel %vm178_vm2, %v165_v14, -inf  ;;  %v296_v29 = vsel %vm283_vm4, %v165_v14, -inf  ;;  %v880_v14 = vpack.c.bf16 %v398_v11, %v396_v10  ;;  %v417_v6 = vld [vmem:[%s1363_s2 + $0x148] sm:$0xff]  ;;  %v416_v10 = vld [vmem:[%s1363_s2 + $0x140] sm:$0xff]  ;;  %v418_v11 = vld [vmem:[%s1363_s2 + $0x150] sm:$0xff] }
 0x116   :  { %v169_v16 = vpop.f32.mrb[8].mxu0  ;;  %v290_v19 = vrot.slane %v289_v13, 4  ;;  %v186_v31 = vmax.f32 %v184_v15, %v185_v22 }
 0x117   :  { %v170_v17 = vadd.f32 %v1143_v56, %v169_v16  ;;  %v171_v18 = vpop.f32.mrb[9].mxu0  ;;  %v400_v16 = vld [vmem:[%s1363_s2 + $0xc0] sm:$0xff] }
 0x118   :  { %v291_v27 = vmax.f32 %v289_v13, %v290_v19  ;;  %v187_v38 = vrot.slane %v186_v31, 1  ;;  %v403_v13 = vld [vmem:[%s1363_s2 + $0xd8] sm:$0xff]  ;;  %v405_v18 = vld [vmem:[%s1363_s2 + $0xe8] sm:$0xff] }
 0x119   :  { %v190_v21 = vsel %vm180_vm3, %v170_v17, -inf  ;;  %v297_v34 = vsel %vm178_vm2, %v170_v17, -inf  ;;  %v882_v15 = vpack.c.bf16 %v403_v13, %v401_v12  ;;  %v402_v17 = vld [vmem:[%s1363_s2 + $0xd0] sm:$0xff]  ;;  %v407_v19 = vld [vmem:[%s1363_s2 + $0xf8] sm:$0xff]  ;;  %v421_v12 = vld [vmem:[%s1363_s2 + $0x168] sm:$0xff] }
 0x11a   :  { %v191_v23 = vmax.f32 %v189_v20, %v190_v21  ;;  %v174_v24 = vpop.f32.mrb[10].mxu0  ;;  %v292_v35 = vrot.slane %v291_v27, 2  ;;  %v188_v47 = vmax.f32 %v186_v31, %v187_v38  ;;  %v884_v21 = vpack.c.bf16 %v402_v17, %v400_v16  ;;  %v19_v31 = vld [vmem:[%s1364_s3] sm:$0x7]  ;;  %v423_v13 = vld [vmem:[%s1363_s2 + $0x178] sm:$0xff]  ;;  %v422_v17 = vld [vmem:[%s1363_s2 + $0x170] sm:$0xff] }
 0x11b   :  { %v175_v25 = vadd.f32 %v1143_v56, %v174_v24  ;;  %v176_v26 = vpop.f32.mrb[11].mxu0  ;;  %v404_v24 = vld [vmem:[%s1363_s2 + $0xe0] sm:$0xff] }
 0x11c   :  { %v192_v28 = vrot.slane %v191_v23, 4  ;;  %v293_v43 = vmax.f32 %v291_v27, %v292_v35  ;;  %v433_v27 = vlaneseq  ;;  %v420_v16 = vld [vmem:[%s1363_s2 + $0x160] sm:$0xff] }
 0x11d   :  { %v298_v30 = vsel %vm286_vm5, %v175_v25, -inf  ;;  %v406_v25 = vld [vmem:[%s1363_s2 + $0xf0] sm:$0xff] }
 0x11e   :  { %v193_v32 = vmax.f32 %v191_v23, %v192_v28  ;;  %v299_v33 = vmax.f32 %v296_v29, %v298_v30  ;;  %v294_v52 = vrot.slane %v293_v43, 1  ;;  %v886_v23 = vpack.c.bf16 %v407_v19, %v405_v18 }
 0x11f   :  { %v888_v26 = vpack.c.bf16 %v406_v25, %v404_v24  ;;  %v1231_v28 = vshrl.u32 %v433_v27, 7  ;;  %v904_v19 = vpack.c.bf16 %v422_v17, %v420_v16 }
 0x120   :  { %v194_v36 = vrot.slane %v193_v32, 2  ;;  %v300_v37 = vmax.f32 %v299_v33, %v297_v34  ;;  %v295_v59 = vmax.f32 %v293_v43, %v294_v52 }
 0x121   :  { %v439_v30 = vsub.s32 1, %v1231_v28 }
 0x122   :  { %v195_v39 = vmax.f32 %v193_v32, %v194_v36  ;;  %v301_v40 = vrot.slane %v300_v37, 4  ;;  %v435_v36 = vsub.s32 0, %v1231_v28 }
 0x123   :  { %v440_v32 = vrot.slane %v19_v31, %v439_v30 }
 0x124   :  { %v196_v44 = vrot.slane %v195_v39, 1  ;;  %v302_v45 = vmax.f32 %v300_v37, %v301_v40  ;;  %v436_v38 = vrot.slane %v19_v31, %v435_v36 }
 0x126   :  { %v303_v46 = vrot.slane %v302_v45, 2  ;;  %v197_v48 = vmax.f32 %v195_v39, %v196_v44  ;;  %v443_v39 = vsub.s32 2, %v1231_v28 }
 0x128   :  { %v304_v53 = vmax.f32 %v302_v45, %v303_v46  ;;  %v205_v54 = vsel %vm204_vm6, %v197_v48, %v188_v47  ;;  %v444_v40 = vrot.slane %v19_v31, %v443_v39  ;;  %v425_v39 = vld [vmem:[%s1363_s2 + $0x190] sm:$0xff] }
 0x129   :  { %794 = vmatmul.mubr.msk.f32.vlgmr.msra.gmra.mrb[0].mxu1 %vm178_vm2, %v205_v54 }
 0x12a   :  { %v305_v57 = vrot.slane %v304_v53, 1  ;;  %870 = vmatpush3.bf16.msra.mxu1 %v869_v49  ;;  %804 = vmatprep.mubr.msk.f32.mxu1 %vm966_vm1, %v967_v55 }
 0x12b   :  { %871 = vmatprep.subr.bf16.mxu1 %v965_v3 }
 0x12c   :  { %v306_v60 = vmax.f32 %v304_v53, %v305_v57 }
 0x12e   :  { %873 = vmatpush3.bf16.msra.mxu1 %v872_v58  ;;  %v313_v61 = vsel %vm204_vm6, %v306_v60, %v295_v59  ;;  %v409_v58 = vld [vmem:[%s1363_s2 + $0x108] sm:$0xff]  ;;  %v411_v59 = vld [vmem:[%s1363_s2 + $0x118] sm:$0xff]  ;;  %v408_v60 = vld [vmem:[%s1363_s2 + $0x100] sm:$0xff] }
 0x12f   :  { %875 = vmatprep.subr.bf16.mxu1 %v874_v4  ;;  %v412_v4 = vld [vmem:[%s1363_s2 + $0x120] sm:$0xff] }
 0x131   :  { %805 = vmatmul.mubr.msk.f32.vlgmr.msra.gmra.mrb[2].mxu1 %vm178_vm2, %v313_v61  ;;  %v890_v61 = vpack.c.bf16 %v411_v59, %v409_v58 }
 0x132   :  { %524 = vmatprep.mubr.f32.mxu1 %v967_v55  ;;  %877 = vmatpush1.bf16.msra.mxu1 %v876_v8  ;;  %v896_v8 = vpack.c.bf16 %v414_v5, %v412_v4 }
 0x133   :  { %879 = vmatprep.subr.bf16.mxu1 %v878_v9  ;;  %v898_v9 = vpack.c.bf16 %v419_v7, %v417_v6 }
 0x136   :  { %881 = vmatpush1.bf16.msra.mxu1 %v880_v14  ;;  %v900_v14 = vpack.c.bf16 %v418_v11, %v416_v10 }
 0x137   :  { %883 = vmatprep.subr.bf16.mxu1 %v882_v15  ;;  %v902_v15 = vpack.c.bf16 %v423_v13, %v421_v12 }
 0x13a   :  { %885 = vmatpush1.bf16.msra.mxu1 %v884_v21 }
 0x13b   :  { %887 = vmatprep.subr.bf16.mxu1 %v886_v23 }
 0x13e   :  { %889 = vmatpush1.bf16.msra.mxu1 %v888_v26 }
 0x13f   :  { %891 = vmatprep.subr.bf16.mxu1 %v890_v61 }
 0x1fc   :  { %v274_v62 = vpop.f32.mrb[0].mxu1 }
 0x1fd   :  { %279 = vrot.lane.b32.xlu0 %v274_v62, %s968_s30  ;;  %v795_v2 = vpop.f32.mrb[1].mxu1  ;;  %v410_v62 = vld [vmem:[%s1363_s2 + $0x110] sm:$0xff] }
 0x1fe   :  { %v892_v1 = vpack.c.bf16 %v410_v62, %v408_v60  ;;  %v894_v2 = vpack.c.bf16 %v415_v0, %v413_v63 }
 0x204   :  { %v382_v20 = vpop.f32.mrb[2].mxu1 }
 0x205   :  { %387 = vrot.lane.b32.xlu0 %v382_v20, %s968_s30  ;;  %v806_v22 = vpop.f32.mrb[3].mxu1  ;;  %v20_v20 = vld [vmem:[%s1364_s3 + $0x2] sm:$0x3] }
 0x206   :  { %v549_v21 = vrot.slane %v20_v20, %v435_v36  ;;  %v553_v24 = vrot.slane %v20_v20, %v439_v30 }
 0x209   :  { %450 = vrot.lane.b32.xlu0 %v440_v32, %s968_s30 }
 0x26f   :  { %v280_v29 = vpop.permute.xlu0 %279 }
 0x270   :  { %v282_v33 = vadd.f32 %v1143_v56, %v280_v29 }
 0x277   :  { %v388_v34 = vpop.permute.xlu0 %387 }
 0x278   :  { %v390_v35 = vadd.f32 %v388_v34, %v282_v33 }
 0x27a   :  { %v391_v37 = vmax.f32 %v390_v35, 0.0 }
 0x27b   :  { %v451_v41 = vpop.permute.xlu0 %450 }
 0x27c   :  { %446 = vrot.lane.b32.xlu1 %v391_v37, %s969_s6 }
 0x280   :  { %448 = vrot.lane.b32.xlu1 %v436_v38, %s968_s30 }
 0x284   :  { %452 = vrot.lane.b32.xlu1 %v444_v40, %s968_s30  ;;  %v426_v40 = vld [vmem:[%s1363_s2 + $0x1a0] sm:$0xff] }
 0x2ee   :  { %v447_v56 = vpop.permute.xlu1 %446 }
 0x2ef   :  { %760 = vmatmul.mubr.msk.f32.vlgmr.msra.gmra.mrb[4].mxu1 %vm64_vm0, %v447_v56 }
 0x2f0   :  { %631 = vmatprep.mubr.f32.mxu1 %v967_v55  ;;  %893 = vmatpush1.bf16.msra.mxu1 %v892_v1 }
 0x2f1   :  { %895 = vmatprep.subr.bf16.mxu1 %v894_v2 }
 0x2f2   :  { %v449_v42 = vpop.permute.xlu1 %448 }
 0x2f3   :  { %v454_v43 = vsel %vm178_vm2, %v449_v42, %v451_v41 }
 0x2f4   :  { %897 = vmatpush1.bf16.msra.mxu1 %v896_v8 }
 0x2f5   :  { %899 = vmatprep.subr.bf16.mxu1 %v898_v9 }
 0x2f6   :  { %v453_v48 = vpop.permute.xlu1 %452 }
 0x2f7   :  { %v455_v49 = vsel %vm178_vm2, %v451_v41, %v453_v48  ;;  %v427_v41 = vld [vmem:[%s1363_s2 + $0x1b0] sm:$0xff] }
 0x2f8   :  { %901 = vmatpush1.bf16.msra.mxu1 %v900_v14  ;;  %v910_v42 = vpack.c.bf16 %v427_v41, %v426_v40 }
 0x2f9   :  { %903 = vmatprep.subr.bf16.mxu1 %v902_v15 }
 0x2fc   :  { %905 = vmatpush1.bf16.msra.mxu1 %v904_v19 }
 0x2fd   :  { %906 = vmatprep.subr.bf16.mxu1 %v965_v3 }
 0x3c2   :  { %v526_v44 = vpop.f32.mrb[4].mxu1 }
 0x3c3   :  { %v527_v45 = vadd.f32 %v526_v44, %v454_v43  ;;  %v528_v46 = vpop.f32.mrb[5].mxu1  ;;  %v428_v43 = vld [vmem:[%s1363_s2 + $0x1c0] sm:$0xff]  ;;  %v429_v44 = vld [vmem:[%s1363_s2 + $0x1d0] sm:$0xff] }
 0x3c4   :  { %v529_v50 = vadd.f32 %v528_v46, %v455_v49  ;;  %v430_v46 = vld [vmem:[%s1363_s2 + $0x1e0] sm:$0xff] }
 0x3c5   :  { %v761_v47 = vmul.f32 -1.442695, %v527_v45  ;;  %v913_v45 = vpack.c.bf16 %v429_v44, %v428_v43 }
 0x3c7   :  { %925 = vpow2.f32 %v761_v47  ;;  %v431_v47 = vld [vmem:[%s1363_s2 + $0x1f0] sm:$0xff] }
 0x3c8   :  { %927 = vtanh.f32 %v529_v50  ;;  %v916_v49 = vpack.c.bf16 %v431_v47, %v430_v46  ;;  %v764_v50 = vld [vmem:[%s1364_s3 + $0x3] ss:$0 sm:$0xff] }
 0x3d1   :  { %v926_v51 = vpop.eup %925 }
 0x3d2   :  { %v534_v52 = vadd.f32 1.0, %v926_v51  ;;  %v928_v53 = vpop.eup %927 }
 0x3d4   :  { %929 = vrcp.f32 %v534_v52 }
 0x3de   :  { %v930_v54 = vpop.eup %929 }
 0x3df   :  { %v538_v57 = vmul.f32 %v930_v54, %v928_v53 }
 0x3e1   :  { %931 = vtanh.f32 %v538_v57 }
 0x3eb   :  { %v932_v18 = vpop.eup %931 }
 0x3ec   :  { %541 = vrot.lane.b32.xlu0 %v932_v18, %s970_s13 }
 0x3f0   :  { %557 = vrot.lane.b32.xlu0 %v549_v21, %s969_s6 }
 0x45e   :  { %v542_v22 = vpop.permute.xlu0 %541 }
 0x45f   :  { %v544_v23 = vmul.f32 %v930_v54, %v542_v22 }
 0x461   :  { %555 = vrot.lane.b32.xlu1 %v544_v23, %s970_s13 }
 0x462   :  { %v558_v27 = vpop.permute.xlu0 %557 }
 0x465   :  { %559 = vrot.lane.b32.xlu1 %v553_v24, %s969_s6 }
 0x4d3   :  { %v556_v25 = vpop.permute.xlu1 %555 }
 0x4d4   :  { %762 = vmatmul.mubr.msk.f32.vlgmr.msra.gmra.mrb[6].mxu1 %vm64_vm0, %v556_v25 }
 0x4d5   :  { %823 = vmatprep.mubr.msk.f32.mxu1 %vm966_vm1, %v967_v55  ;;  %v424_v55 = vld [vmem:[%s1363_s2 + $0x180] sm:$0xff]  ;;  %s971_s2 = smov [#allocation2]  }
 0x4d6   :  { %v907_v56 = vpack.c.bf16 %v425_v39, %v424_v55  ;;  %s743_s7 = sshll.u32 %s971_s2, 4  ;;  %s744_s7 = int_to_ptr.vmem [resolvable:$true] %s743_s7 }
 0x4d7   :  { %v560_v26 = vpop.permute.xlu1 %559  ;;  %s941_s8 = scalar_lea.vmem %s744_s7, 32  ;;  %p946_p1 = scmp.lt.s32.totalorder %s744_s7, %s744_s7 }
 0x4d8   :  { %v562_v29 = vsel %vm561_vm7, %v558_v27, %v560_v26  ;;  %908 = vmatpush3.bf16.msra.mxu1 %v907_v56  ;;  %p942_p0 = scmp.ne.s32.totalorder %s744_s7, %s941_s8  ;;  %p947_p2 = scmp.lt.s32.totalorder %s941_s8, %s941_s8 }
 0x4d9   :  { %909 = vmatprep.subr.bf16.mxu1 %v965_v3 }
 0x4da   :  { %p948_p3 = por %p947_p2, %p946_p1 }
 0x4dc   :  { %911 = vmatpush3.bf16.msra.mxu1 %v910_v42  ;;  %p949_p4 = pnand %p948_p3, %p942_p0 }
 0x4dd   :  { %912 = vmatprep.subr.bf16.mxu1 %v965_v3 }
 0x4e0   :  { %914 = vmatpush3.bf16.msra.mxu1 %v913_v45 }
 0x4e1   :  { %915 = vmatprep.subr.bf16.mxu1 %v965_v3 }
 0x4e4   :  { %917 = vmatpush3.bf16.msra.mxu1 %v916_v49 }
 0x5a7   :  { %v633_v31 = vpop.f32.mrb[6].mxu1 }
 0x5a8   :  { %v634_v32 = vadd.f32 %v633_v31, %v562_v29  ;;  %v635_v33 = vpop.f32.mrb[7].mxu1 }
 0x5a9   :  { %v636_v35 = vadd.f32 %v635_v33, %v560_v26 }
 0x5aa   :  { %v763_v34 = vmul.f32 -1.442695, %v634_v32 }
 0x5ac   :  { %933 = vpow2.f32 %v763_v34 }
 0x5ad   :  { %935 = vtanh.f32 %v636_v35 }
 0x5b6   :  { %v934_v28 = vpop.eup %933 }
 0x5b7   :  { %v641_v30 = vadd.f32 1.0, %v934_v28  ;;  %v936_v36 = vpop.eup %935 }
 0x5b9   :  { %937 = vrcp.f32 %v641_v30 }
 0x5c3   :  { %v938_v37 = vpop.eup %937 }
 0x5c4   :  { %v645_v38 = vmul.f32 %v938_v37, %v936_v36 }
 0x5c6   :  { %939 = vtanh.f32 %v645_v38 }
 0x5d0   :  { %v940_v48 = vpop.eup %939 }
 0x5d1   :  { %648 = vrot.lane.b32.xlu0 %v940_v48, %s970_s13 }
 0x5d5   :  { %660 = vrot.lane.b32.xlu0 %v764_v50, %s968_s30 }
 0x643   :  { %v649_v51 = vpop.permute.xlu0 %648 }
 0x644   :  { %v651_v52 = vmul.f32 %v938_v37, %v649_v51 }
 0x646   :  { %658 = vrot.lane.b32.xlu1 %v651_v52, %s970_s13 }
 0x647   :  { %v661_v54 = vpop.permute.xlu0 %660 }
 0x6b8   :  { %v659_v53 = vpop.permute.xlu1 %658 }
 0x6b9   :  { %824 = vmatmul.mubr.msk.f32.vlgmr.msra.gmra.mrb[8].mxu1 %vm64_vm0, %v659_v53 }
 0x78c   :  { %v731_v57 = vpop.f32.mrb[8].mxu1 }
 0x78d   :  { %v732_v3 = vadd.f32 %v731_v57, %v661_v54  ;;  %v825_v58 = vpop.f32.mrb[9].mxu1 }
 0x78f   :  { %736 = vst.msk [vmem:[#allocation2] sm:$0x3] %vm735_vm8, %v732_v3 }
 0x790   :  { %952 = shalt.err (!%p949_p4)
}
 0x791   :  { %s953_s9 = scalar_lea.hbm %s1365_s4, 32 }
 0x792   :  { %p954_p5 = scmp.ne.s32.totalorder %s1365_s4, %s953_s9  ;;  %p957_p6 = scmp.lt.u32.totalorder %s953_s9, %s1365_s4 }
 0x794   :  { %p959_p7 = pnand %p957_p6, %p954_p5 }
 0x796   :  { %962 = shalt.err (!%p959_p7)
}
 0x797   :  { %746 = dma.vmem_to_hbm [thread:$0]  %s744_s7, 32, %s1365_s4, [#allocation3]  }
 0x798   :  { %963 = dma.done.wait [#allocation3], 32  }
 0x799   :  { %964 = vsyncadd [#allocation3], 4294967264 }
 0x79a   :  { %750 = vsyncpa [#allocation3], 1 }

</bundles_post_ra>
